<compile_context>
chip_gen: v5e
topology: v5e:2x2
jax: 0.10.0
libtpu: 0.0.40
codegen_flags: <defaults>
</compile_context>

<pallas_src>
import functools
import math

import jax
import jax.numpy as jnp
from jax import lax
from jax.experimental import pallas as pl
from jax.experimental.pallas import tpu as pltpu


_NT_DIMS = (((1,), (1,)), ((), ()))   # contract last dims: (m,k) x (n,k) -> (m,n)


def _mha_kernel(q_ref, k_ref, v_ref,
                wq_ref, bq_ref, wk_ref, bk_ref, wv_ref, bv_ref,
                wo_ref, bo_ref,
                out_ref,
                acc_ref,
                *, kv_block, num_kv_blocks):
    """One grid step = one (batch, q-block, head) triple.

    q_ref   : (q_block, E)   current query rows (batch dim squeezed)
    k_ref   : (S, E), v_ref : (S, E)  full keys/values of this batch element
    w*_ref  : (H, hd, E) bf16 per-head weight blocks (single VMEM copy)
    b*_ref  : (H, 1, hd) f32, bo_ref : (1, E) f32
    out_ref : (q_block, E)   written on the last head
    acc_ref : (q_block, E) f32 scratch accumulator across the head grid axis
    """
    f32 = jnp.float32
    bf16 = jnp.bfloat16
    h = pl.program_id(2)
    num_heads = pl.num_programs(2)

    # Per-head Q projection ("NT" MXU dot; 1/sqrt(hd) already folded into wq/bq).
    xq = q_ref[...].astype(bf16)                               # cast in-kernel
    q_h = (lax.dot_general(xq, wq_ref[h], _NT_DIMS,
                           preferred_element_type=f32) + bq_ref[h]).astype(bf16)
    q_rows, head_dim = q_h.shape

    def kv_step(i, carry):
        m_prev, l_prev, pv_prev = carry
        start = pl.multiple_of(i * kv_block, kv_block)
        xk = k_ref[pl.ds(start, kv_block), :].astype(bf16)
        xv = v_ref[pl.ds(start, kv_block), :].astype(bf16)
        k_h = (lax.dot_general(xk, wk_ref[h], _NT_DIMS,
                               preferred_element_type=f32) + bk_ref[h]).astype(bf16)
        v_h = (lax.dot_general(xv, wv_ref[h], _NT_DIMS,
                               preferred_element_type=f32) + bv_ref[h]).astype(bf16)

        s = lax.dot_general(q_h, k_h, _NT_DIMS, preferred_element_type=f32)
        # TODO(synk): optional `mask` of the PyTorch forward is not implemented
        # (mask=None path only); it would be applied to `s` here.
        m_cur = jnp.max(s, axis=-1, keepdims=True)
        m_new = jnp.maximum(m_prev, m_cur)
        alpha = jnp.exp(m_prev - m_new)
        p = jnp.exp(s - m_new)
        l_new = alpha * l_prev + jnp.sum(p, axis=-1, keepdims=True)
        pv_new = alpha * pv_prev + jnp.dot(p.astype(bf16), v_h,
                                           preferred_element_type=f32)
        return m_new, l_new, pv_new

    init = (jnp.full((q_rows, 1), -1e30, f32),       # running max
            jnp.zeros((q_rows, 1), f32),             # running denom
            jnp.zeros((q_rows, head_dim), f32))      # running PV accumulator
    _, l_fin, pv_fin = lax.fori_loop(0, num_kv_blocks, kv_step, init)

    # Softmax normalization on the EUP (approx reciprocal: ~1e-3 rel; use
    # approx=False for tighter parity).  Then fuse "concat heads + out_linear":
    # this head's ctx @ Wo_h is accumulated over the head grid axis.
    ctx = (pv_fin * pl.reciprocal(l_fin, approx=True)).astype(bf16)
    contrib = jnp.dot(ctx, wo_ref[h], preferred_element_type=f32)   # (q_block, E)

    @pl.when(h == 0)
    def _():
        acc_ref[...] = jnp.zeros_like(acc_ref)

    acc_ref[...] += contrib

    @pl.when(h == num_heads - 1)
    def _():
        out_ref[...] = (acc_ref[...] + bo_ref[...]).astype(out_ref.dtype)


def prepare_params(raw_params, *, num_heads, weight_dtype=jnp.bfloat16):
    """One-time conversion of PyTorch-layout f32 params for the kernel.

    nn.Linear stores W as (out_features, in_features) and computes x @ W.T + b.
    The kernel wants per-head (head_dim, emb) blocks:
      * wq/wk/wv[h] = rows [h*hd, (h+1)*hd) of W  (used via an "NT" dot, so no
        transpose is needed at all),
      * wo[h]       = rows [h*hd, (h+1)*hd) of Wo.T,
    with 1/sqrt(head_dim) folded into wq/bq, weights cast to bf16, biases f32.
    """
    emb = raw_params["wq"].shape[0]
    assert emb % num_heads == 0
    head_dim = emb // num_heads
    scale = 1.0 / math.sqrt(head_dim)

    def qkv_w(name, s=1.0):
        w = raw_params[name] * s                                    # (out=E, in=E)
        return w.reshape(num_heads, head_dim, emb).astype(weight_dtype)

    def qkv_b(name, s=1.0):
        return (raw_params[name] * s).reshape(num_heads, 1, head_dim).astype(jnp.float32)

    wo = raw_params["wo"].T.reshape(num_heads, head_dim, emb).astype(weight_dtype)
    bo = raw_params["bo"].reshape(1, emb).astype(jnp.float32)

    return {
        "wq": qkv_w("wq", scale), "bq": qkv_b("bq", scale),
        "wk": qkv_w("wk"), "bk": qkv_b("bk"),
        "wv": qkv_w("wv"), "bv": qkv_b("bv"),
        "wo": wo, "bo": bo,
    }


def _default_vmem_limit():
    # Leave 1/8 of physical VMEM as headroom for Mosaic internal scratch /
    # semaphores: ~112 MiB on v5e/v6e (128 MiB), ~56 MiB on v7x (64 MiB / TC).
    try:
        capacity = pltpu.get_tpu_info().vmem_capacity_bytes
    except Exception:  # conservative fallback if the query is unavailable
        capacity = 64 * 1024 * 1024
    return int(capacity - capacity // 8)


def multi_head_attention(query, key, value, prepared, *, num_heads, mask=None,
                         q_block=None, kv_block=None, out_dtype=None):
    """query/key/value: (B, S, E).  prepared: output of prepare_params()."""
    if mask is not None:
        # TODO(synk): attention mask is not implemented in the kernel yet.
        raise NotImplementedError("multi_head_attention: mask is not supported")

    B, S, E = query.shape
    assert key.shape == value.shape == (B, S, E)
    assert E % num_heads == 0
    out_dtype = query.dtype if out_dtype is None else out_dtype  # bf16 allowed

    # --- tile selection ------------------------------------------------------
    # q_block: second "parallel" grid axis (keeps both v7x TCs busy, bounds the
    # per-step q/acc footprint).  Larger q_block amortizes the K/V-projection
    # recompute across q blocks, so it is only split when S is big (or B == 1).
    if q_block is None:
        q_block = 512 if (S % 512 == 0 and S > 512) else S
        if q_block == S and B == 1 and S % 16 == 0:
            q_block = S // 2            # guarantee >= 2 parallel steps at B == 1
    assert S % q_block == 0
    assert q_block == S or q_block % 8 == 0, "q_block must be sublane aligned"

    # kv_block: in-kernel flash-loop chunk; working set is O(q_block * kv_block).
    if kv_block is None:
        kv_block = 512 if (S % 512 == 0 and S > 512) else S
    assert S % kv_block == 0
    assert kv_block == S or kv_block % 8 == 0, "kv_block must be sublane aligned"

    num_q_blocks = S // q_block
    num_kv_blocks = S // kv_block

    kernel = functools.partial(_mha_kernel, kv_block=kv_block,
                               num_kv_blocks=num_kv_blocks)

    # Activations: batch dim squeezed; q/out tiled over (b, sq); the full K/V
    # rows of the current batch element stay VMEM-resident and are consumed
    # chunk-by-chunk by the in-kernel flash loop.
    q_spec = pl.BlockSpec((None, q_block, E), lambda b, sq, h: (b, sq, 0))
    kv_spec = pl.BlockSpec((None, S, E), lambda b, sq, h: (b, 0, 0))
    out_spec = pl.BlockSpec((None, q_block, E), lambda b, sq, h: (b, sq, 0))
    # Grid-invariant weights/biases: whole array in VMEM, single copy, DMA'd
    # once (no double-buffering of constant operands).
    const_spec = pl.BlockSpec(memory_space=pltpu.MemorySpace.VMEM)

    return pl.pallas_call(
        kernel,
        out_shape=jax.ShapeDtypeStruct((B, S, E), out_dtype),
        grid_spec=pltpu.PrefetchScalarGridSpec(
            num_scalar_prefetch=0,
            grid=(B, num_q_blocks, num_heads),
            in_specs=[q_spec, kv_spec, kv_spec] + [const_spec] * 8,
            out_specs=out_spec,
            scratch_shapes=[pltpu.VMEM((q_block, E), jnp.float32)]),
        compiler_params=pltpu.CompilerParams(
            dimension_semantics=("parallel", "parallel", "arbitrary"),
            vmem_limit_bytes=_default_vmem_limit()),
    )(query, key, value,
      prepared["wq"], prepared["bq"], prepared["wk"], prepared["bk"],
      prepared["wv"], prepared["bv"], prepared["wo"], prepared["bo"])


def _init_params(key, emb_dim):
    # Deterministic init mimicking nn.Linear default: U(-1/sqrt(in), 1/sqrt(in)).
    bound = 1.0 / jnp.sqrt(jnp.float32(emb_dim))
    keys = jax.random.split(key, 8)

    def u(k, shape):
        return jax.random.uniform(k, shape, jnp.float32, -bound, bound)

    return {
        "wq": u(keys[0], (emb_dim, emb_dim)), "bq": u(keys[1], (emb_dim,)),
        "wk": u(keys[2], (emb_dim, emb_dim)), "bk": u(keys[3], (emb_dim,)),
        "wv": u(keys[4], (emb_dim, emb_dim)), "bv": u(keys[5], (emb_dim,)),
        "wo": u(keys[6], (emb_dim, emb_dim)), "bo": u(keys[7], (emb_dim,)),
    }


def _reference(query, key, value, params, *, num_heads):
    # Pure-JAX f32 reference matching the PyTorch forward (mask=None path).
    B, S, E = query.shape
    hd = E // num_heads

    def lin(x, w, b):  # nn.Linear semantics
        return x @ w.T + b

    Q = lin(query, params["wq"], params["bq"])
    K = lin(key, params["wk"], params["bk"])
    V = lin(value, params["wv"], params["bv"])

    def split(x):
        return x.reshape(B, S, num_heads, hd).transpose(0, 2, 1, 3)

    Q, K, V = split(Q), split(K), split(V)
    scores = jnp.einsum("bhqd,bhkd->bhqk", Q, K) / jnp.sqrt(jnp.float32(hd))
    w = jax.nn.softmax(scores, axis=-1)
    out = jnp.einsum("bhqk,bhkd->bhqd", w, V)
    out = out.transpose(0, 2, 1, 3).reshape(B, S, E)
    return lin(out, params["wo"], params["bo"])


if __name__ == "__main__":
    B, S, E, H = 2, 8, 32, 4
    root = jax.random.PRNGKey(0)
    kq, kk, kv, kp = jax.random.split(root, 4)
    query = jax.random.normal(kq, (B, S, E), jnp.float32)
    key = jax.random.normal(kk, (B, S, E), jnp.float32)
    value = jax.random.normal(kv, (B, S, E), jnp.float32)

    raw_params = _init_params(kp, E)
    prepared = prepare_params(raw_params, num_heads=H)

    out = multi_head_attention(query, key, value, prepared, num_heads=H)
    out = jax.block_until_ready(out)

    ref = _reference(query, key, value, raw_params, num_heads=H)
    assert out.shape == (B, S, E)
    assert out.dtype == jnp.float32
    # bf16 MXU operands + approx reciprocal -> compare at bf16-level tolerance.
    max_err = float(jnp.max(jnp.abs(out - ref)))
    assert jnp.allclose(out, ref, atol=5e-2, rtol=5e-2), f"mismatch: {max_err}"
    print("KERNEL_OK")
</pallas_src>

<mosaic_0001>
module attributes {stable_mosaic.version = 11 : i64} {
  func.func @_mha_kernel(%arg0: i32, %arg1: i32, %arg2: i32, %arg3: memref<1x8x32xf32, #tpu.memory_space<vmem>>, %arg4: memref<1x8x32xf32, #tpu.memory_space<vmem>>, %arg5: memref<1x8x32xf32, #tpu.memory_space<vmem>>, %arg6: memref<4x8x32xbf16, #tpu.memory_space<vmem>>, %arg7: memref<4x1x8xf32, #tpu.memory_space<vmem>>, %arg8: memref<4x8x32xbf16, #tpu.memory_space<vmem>>, %arg9: memref<4x1x8xf32, #tpu.memory_space<vmem>>, %arg10: memref<4x8x32xbf16, #tpu.memory_space<vmem>>, %arg11: memref<4x1x8xf32, #tpu.memory_space<vmem>>, %arg12: memref<4x8x32xbf16, #tpu.memory_space<vmem>>, %arg13: memref<1x32xf32, #tpu.memory_space<vmem>>, %arg14: memref<1x8x32xf32, #tpu.memory_space<vmem>>, %arg15: memref<8x32xf32, #tpu.memory_space<vmem>>) attributes {dimension_semantics = [#tpu.dimension_semantics<parallel>, #tpu.dimension_semantics<parallel>, #tpu.dimension_semantics<arbitrary>], iteration_bounds = array<i64: 2, 1, 4>, scalar_prefetch = 0 : i64, scratch_operands = 1 : i64, tpu.core_type = #tpu.core_type<tc>, window_params = [{transform_indices = @transform_0, window_bounds = array<i64: 1, 8, 32>}, {transform_indices = @transform_1, window_bounds = array<i64: 1, 8, 32>}, {transform_indices = @transform_2, window_bounds = array<i64: 1, 8, 32>}, {pipeline_mode = #tpu.pipeline_mode<synchronous>, transform_indices = @transform_3, window_bounds = array<i64: 4, 8, 32>}, {pipeline_mode = #tpu.pipeline_mode<synchronous>, transform_indices = @transform_4, window_bounds = array<i64: 4, 1, 8>}, {pipeline_mode = #tpu.pipeline_mode<synchronous>, transform_indices = @transform_5, window_bounds = array<i64: 4, 8, 32>}, {pipeline_mode = #tpu.pipeline_mode<synchronous>, transform_indices = @transform_6, window_bounds = array<i64: 4, 1, 8>}, {pipeline_mode = #tpu.pipeline_mode<synchronous>, transform_indices = @transform_7, window_bounds = array<i64: 4, 8, 32>}, {pipeline_mode = #tpu.pipeline_mode<synchronous>, transform_indices = @transform_8, window_bounds = array<i64: 4, 1, 8>}, {pipeline_mode = #tpu.pipeline_mode<synchronous>, transform_indices = @transform_9, window_bounds = array<i64: 4, 8, 32>}, {pipeline_mode = #tpu.pipeline_mode<synchronous>, transform_indices = @transform_10, window_bounds = array<i64: 1, 32>}, {transform_indices = @transform_11, window_bounds = array<i64: 1, 8, 32>}]} {
    %c0 = arith.constant 0 : index
    %c0_0 = arith.constant 0 : index
    %c0_1 = arith.constant 0 : index
    %0 = vector.load %arg3[%c0, %c0_0, %c0_1] : memref<1x8x32xf32, #tpu.memory_space<vmem>>, vector<1x8x32xf32>
    %1 = vector.shape_cast %0 : vector<1x8x32xf32> to vector<8x32xf32>
    %2 = arith.truncf %1 : vector<8x32xf32> to vector<8x32xbf16>
    %3 = arith.index_cast %arg2 : i32 to index
    %c0_2 = arith.constant 0 : index
    %c0_3 = arith.constant 0 : index
    %4 = vector.load %arg6[%3, %c0_2, %c0_3] : memref<4x8x32xbf16, #tpu.memory_space<vmem>>, vector<1x8x32xbf16>
    %5 = vector.shape_cast %4 : vector<1x8x32xbf16> to vector<8x32xbf16>
    %cst = arith.constant dense<0.000000e+00> : vector<8x8xf32>
    %6 = tpu.matmul %2, %5, %cst {dimension_numbers = #tpu.dot_dimension_numbers<[1], [1], [0], [0], [0, 0, 1, 0], [], []>} : vector<8x32xbf16>, vector<8x32xbf16>, vector<8x8xf32> -> vector<8x8xf32>
    %7 = arith.index_cast %arg2 : i32 to index
    %c0_4 = arith.constant 0 : index
    %c0_5 = arith.constant 0 : index
    %8 = vector.load %arg7[%7, %c0_4, %c0_5] : memref<4x1x8xf32, #tpu.memory_space<vmem>>, vector<1x1x8xf32>
    %9 = vector.shape_cast %8 : vector<1x1x8xf32> to vector<1x8xf32>
    %10 = vector.broadcast %9 : vector<1x8xf32> to vector<8x8xf32>
    %11 = arith.addf %6, %10 : vector<8x8xf32>
    %12 = arith.truncf %11 : vector<8x8xf32> to vector<8x8xbf16>
    %cst_6 = arith.constant -1.000000e+30 : f32
    %13 = vector.broadcast %cst_6 : f32 to vector<8x1xf32>
    %cst_7 = arith.constant 0.000000e+00 : f32
    %14 = vector.broadcast %cst_7 : f32 to vector<8x1xf32>
    %cst_8 = arith.constant 0.000000e+00 : f32
    %15 = vector.broadcast %cst_8 : f32 to vector<8x8xf32>
    %c0_i32 = arith.constant 0 : i32
    %c8_i32 = arith.constant 8 : i32
    %16 = arith.muli %c0_i32, %c8_i32 : i32
    %17 = tpu.assume_multiple %16, 8 : i32
    %c0_9 = arith.constant 0 : index
    %18 = arith.index_cast %17 : i32 to index
    %c0_10 = arith.constant 0 : index
    %19 = vector.load %arg4[%c0_9, %18, %c0_10] : memref<1x8x32xf32, #tpu.memory_space<vmem>>, vector<1x8x32xf32>
    %20 = vector.shape_cast %19 : vector<1x8x32xf32> to vector<8x32xf32>
    %21 = arith.truncf %20 : vector<8x32xf32> to vector<8x32xbf16>
    %c0_11 = arith.constant 0 : index
    %22 = arith.index_cast %17 : i32 to index
    %c0_12 = arith.constant 0 : index
    %23 = vector.load %arg5[%c0_11, %22, %c0_12] : memref<1x8x32xf32, #tpu.memory_space<vmem>>, vector<1x8x32xf32>
    %24 = vector.shape_cast %23 : vector<1x8x32xf32> to vector<8x32xf32>
    %25 = arith.truncf %24 : vector<8x32xf32> to vector<8x32xbf16>
    %26 = arith.index_cast %arg2 : i32 to index
    %c0_13 = arith.constant 0 : index
    %c0_14 = arith.constant 0 : index
    %27 = vector.load %arg8[%26, %c0_13, %c0_14] : memref<4x8x32xbf16, #tpu.memory_space<vmem>>, vector<1x8x32xbf16>
    %28 = vector.shape_cast %27 : vector<1x8x32xbf16> to vector<8x32xbf16>
    %cst_15 = arith.constant dense<0.000000e+00> : vector<8x8xf32>
    %29 = tpu.matmul %21, %28, %cst_15 {dimension_numbers = #tpu.dot_dimension_numbers<[1], [1], [0], [0], [0, 0, 1, 0], [], []>} : vector<8x32xbf16>, vector<8x32xbf16>, vector<8x8xf32> -> vector<8x8xf32>
    %30 = arith.index_cast %arg2 : i32 to index
    %c0_16 = arith.constant 0 : index
    %c0_17 = arith.constant 0 : index
    %31 = vector.load %arg9[%30, %c0_16, %c0_17] : memref<4x1x8xf32, #tpu.memory_space<vmem>>, vector<1x1x8xf32>
    %32 = vector.shape_cast %31 : vector<1x1x8xf32> to vector<1x8xf32>
    %33 = vector.broadcast %32 : vector<1x8xf32> to vector<8x8xf32>
    %34 = arith.addf %29, %33 : vector<8x8xf32>
    %35 = arith.truncf %34 : vector<8x8xf32> to vector<8x8xbf16>
    %36 = arith.index_cast %arg2 : i32 to index
    %c0_18 = arith.constant 0 : index
    %c0_19 = arith.constant 0 : index
    %37 = vector.load %arg10[%36, %c0_18, %c0_19] : memref<4x8x32xbf16, #tpu.memory_space<vmem>>, vector<1x8x32xbf16>
    %38 = vector.shape_cast %37 : vector<1x8x32xbf16> to vector<8x32xbf16>
    %cst_20 = arith.constant dense<0.000000e+00> : vector<8x8xf32>
    %39 = tpu.matmul %25, %38, %cst_20 {dimension_numbers = #tpu.dot_dimension_numbers<[1], [1], [0], [0], [0, 0, 1, 0], [], []>} : vector<8x32xbf16>, vector<8x32xbf16>, vector<8x8xf32> -> vector<8x8xf32>
    %40 = arith.index_cast %arg2 : i32 to index
    %c0_21 = arith.constant 0 : index
    %c0_22 = arith.constant 0 : index
    %41 = vector.load %arg11[%40, %c0_21, %c0_22] : memref<4x1x8xf32, #tpu.memory_space<vmem>>, vector<1x1x8xf32>
    %42 = vector.shape_cast %41 : vector<1x1x8xf32> to vector<1x8xf32>
    %43 = vector.broadcast %42 : vector<1x8xf32> to vector<8x8xf32>
    %44 = arith.addf %39, %43 : vector<8x8xf32>
    %45 = arith.truncf %44 : vector<8x8xf32> to vector<8x8xbf16>
    %cst_23 = arith.constant dense<0.000000e+00> : vector<8x8xf32>
    %46 = tpu.matmul %12, %35, %cst_23 {dimension_numbers = #tpu.dot_dimension_numbers<[1], [1], [0], [0], [0, 0, 1, 0], [], []>} : vector<8x8xbf16>, vector<8x8xbf16>, vector<8x8xf32> -> vector<8x8xf32>
    %cst_24 = arith.constant dense<0xFF800000> : vector<8xf32>
    %47 = vector.multi_reduction <maximumf>, %46, %cst_24 [1] : vector<8x8xf32> to vector<8xf32>
    %48 = vector.shape_cast %47 : vector<8xf32> to vector<8x1xf32>
    %49 = arith.maximumf %13, %48 : vector<8x1xf32>
    %50 = arith.subf %13, %49 : vector<8x1xf32>
    %51 = math.exp %50 : vector<8x1xf32>
    %52 = vector.broadcast %49 : vector<8x1xf32> to vector<8x8xf32>
    %53 = arith.subf %46, %52 : vector<8x8xf32>
    %54 = math.exp %53 : vector<8x8xf32>
    %55 = arith.mulf %51, %14 : vector<8x1xf32>
    %cst_25 = arith.constant dense<0.000000e+00> : vector<8xf32>
    %56 = vector.multi_reduction <add>, %54, %cst_25 [1] : vector<8x8xf32> to vector<8xf32>
    %57 = vector.shape_cast %56 : vector<8xf32> to vector<8x1xf32>
    %58 = arith.addf %55, %57 : vector<8x1xf32>
    %59 = vector.broadcast %51 : vector<8x1xf32> to vector<8x8xf32>
    %60 = arith.mulf %59, %15 : vector<8x8xf32>
    %61 = arith.truncf %54 : vector<8x8xf32> to vector<8x8xbf16>
    %cst_26 = arith.constant dense<0.000000e+00> : vector<8x8xf32>
    %62 = tpu.matmul %61, %45, %cst_26 {dimension_numbers = #tpu.dot_dimension_numbers<[1], [0], [0], [1], [0, 0, 1, 1], [], []>} : vector<8x8xbf16>, vector<8x8xbf16>, vector<8x8xf32> -> vector<8x8xf32>
    %63 = arith.addf %60, %62 : vector<8x8xf32>
    %c1_i32 = arith.constant 1 : i32
    %64 = tpu.reciprocal %58 {approx = true} : vector<8x1xf32> -> vector<8x1xf32>
    %65 = vector.broadcast %64 : vector<8x1xf32> to vector<8x8xf32>
    %66 = arith.mulf %63, %65 : vector<8x8xf32>
    %67 = arith.truncf %66 : vector<8x8xf32> to vector<8x8xbf16>
    %68 = arith.index_cast %arg2 : i32 to index
    %c0_27 = arith.constant 0 : index
    %c0_28 = arith.constant 0 : index
    %69 = vector.load %arg12[%68, %c0_27, %c0_28] : memref<4x8x32xbf16, #tpu.memory_space<vmem>>, vector<1x8x32xbf16>
    %70 = vector.shape_cast %69 : vector<1x8x32xbf16> to vector<8x32xbf16>
    %cst_29 = arith.constant dense<0.000000e+00> : vector<8x32xf32>
    %71 = tpu.matmul %67, %70, %cst_29 {dimension_numbers = #tpu.dot_dimension_numbers<[1], [0], [0], [1], [0, 0, 1, 1], [], []>} : vector<8x8xbf16>, vector<8x32xbf16>, vector<8x32xf32> -> vector<8x32xf32>
    %c0_i32_30 = arith.constant 0 : i32
    %72 = arith.cmpi eq, %arg2, %c0_i32_30 : i32
    %73 = arith.extui %72 : i1 to i32
    %c0_i32_31 = arith.constant 0 : i32
    %74 = arith.cmpi ne, %73, %c0_i32_31 : i32
    scf.if %74 {
      %cst_37 = arith.constant 0.000000e+00 : f32
      %81 = vector.broadcast %cst_37 : f32 to vector<8x32xf32>
      %c0_38 = arith.constant 0 : index
      %c0_39 = arith.constant 0 : index
      %82 = vector.load %arg15[%c0_38, %c0_39] : memref<8x32xf32, #tpu.memory_space<vmem>>, vector<8x32xf32>
      tpu.vector_store %arg15[%c0_38, %c0_39], %81 {strides = array<i32>} : memref<8x32xf32, #tpu.memory_space<vmem>>, vector<8x32xf32>,
    } else {
    }
    %c0_32 = arith.constant 0 : index
    %c0_33 = arith.constant 0 : index
    %75 = vector.load %arg15[%c0_32, %c0_33] : memref<8x32xf32, #tpu.memory_space<vmem>>, vector<8x32xf32>
    %76 = arith.addf %75, %71 : vector<8x32xf32>
    %c0_34 = arith.constant 0 : index
    %c0_35 = arith.constant 0 : index
    %77 = vector.load %arg15[%c0_34, %c0_35] : memref<8x32xf32, #tpu.memory_space<vmem>>, vector<8x32xf32>
    tpu.vector_store %arg15[%c0_34, %c0_35], %76 {strides = array<i32>} : memref<8x32xf32, #tpu.memory_space<vmem>>, vector<8x32xf32>,
    %c3_i32 = arith.constant 3 : i32
    %78 = arith.cmpi eq, %arg2, %c3_i32 : i32
    %79 = arith.extui %78 : i1 to i32
    %c0_i32_36 = arith.constant 0 : i32
    %80 = arith.cmpi ne, %79, %c0_i32_36 : i32
    scf.if %80 {
      %c0_37 = arith.constant 0 : index
      %c0_38 = arith.constant 0 : index
      %81 = vector.load %arg15[%c0_37, %c0_38] : memref<8x32xf32, #tpu.memory_space<vmem>>, vector<8x32xf32>
      %c0_39 = arith.constant 0 : index
      %c0_40 = arith.constant 0 : index
      %82 = vector.load %arg13[%c0_39, %c0_40] : memref<1x32xf32, #tpu.memory_space<vmem>>, vector<1x32xf32>
      %83 = vector.broadcast %82 : vector<1x32xf32> to vector<8x32xf32>
      %84 = arith.addf %81, %83 : vector<8x32xf32>
      %c0_41 = arith.constant 0 : index
      %c0_42 = arith.constant 0 : index
      %c0_43 = arith.constant 0 : index
      %85 = vector.load %arg14[%c0_41, %c0_42, %c0_43] : memref<1x8x32xf32, #tpu.memory_space<vmem>>, vector<1x8x32xf32>
      %86 = vector.shape_cast %85 : vector<1x8x32xf32> to vector<8x32xf32>
      %87 = vector.shape_cast %84 : vector<8x32xf32> to vector<1x8x32xf32>
      tpu.vector_store %arg14[%c0_41, %c0_42, %c0_43], %87 {strides = array<i32>} : memref<1x8x32xf32, #tpu.memory_space<vmem>>, vector<1x8x32xf32>,
    } else {
    }
    return
  }
  func.func @transform_0(%arg0: i32, %arg1: i32, %arg2: i32) -> (i32, i32, i32) {
    %c0_i32 = arith.constant 0 : i32
    %c0_i32_0 = arith.constant 0 : i32
    return %arg0, %arg1, %c0_i32 : i32, i32, i32
  }
  func.func @transform_1(%arg0: i32, %arg1: i32, %arg2: i32) -> (i32, i32, i32) {
    %c0_i32 = arith.constant 0 : i32
    %c0_i32_0 = arith.constant 0 : i32
    %c0_i32_1 = arith.constant 0 : i32
    return %arg0, %c0_i32, %c0_i32_0 : i32, i32, i32
  }
  func.func @transform_2(%arg0: i32, %arg1: i32, %arg2: i32) -> (i32, i32, i32) {
    %c0_i32 = arith.constant 0 : i32
    %c0_i32_0 = arith.constant 0 : i32
    %c0_i32_1 = arith.constant 0 : i32
    return %arg0, %c0_i32, %c0_i32_0 : i32, i32, i32
  }
  func.func @transform_3(%arg0: i32, %arg1: i32, %arg2: i32) -> (i32, i32, i32) {
    %c0_i32 = arith.constant 0 : i32
    %c0_i32_0 = arith.constant 0 : i32
    %c0_i32_1 = arith.constant 0 : i32
    %c0_i32_2 = arith.constant 0 : i32
    return %c0_i32, %c0_i32_0, %c0_i32_1 : i32, i32, i32
  }
  func.func @transform_4(%arg0: i32, %arg1: i32, %arg2: i32) -> (i32, i32, i32) {
    %c0_i32 = arith.constant 0 : i32
    %c0_i32_0 = arith.constant 0 : i32
    %c0_i32_1 = arith.constant 0 : i32
    %c0_i32_2 = arith.constant 0 : i32
    return %c0_i32, %c0_i32_0, %c0_i32_1 : i32, i32, i32
  }
  func.func @transform_5(%arg0: i32, %arg1: i32, %arg2: i32) -> (i32, i32, i32) {
    %c0_i32 = arith.constant 0 : i32
    %c0_i32_0 = arith.constant 0 : i32
    %c0_i32_1 = arith.constant 0 : i32
    %c0_i32_2 = arith.constant 0 : i32
    return %c0_i32, %c0_i32_0, %c0_i32_1 : i32, i32, i32
  }
  func.func @transform_6(%arg0: i32, %arg1: i32, %arg2: i32) -> (i32, i32, i32) {
    %c0_i32 = arith.constant 0 : i32
    %c0_i32_0 = arith.constant 0 : i32
    %c0_i32_1 = arith.constant 0 : i32
    %c0_i32_2 = arith.constant 0 : i32
    return %c0_i32, %c0_i32_0, %c0_i32_1 : i32, i32, i32
  }
  func.func @transform_7(%arg0: i32, %arg1: i32, %arg2: i32) -> (i32, i32, i32) {
    %c0_i32 = arith.constant 0 : i32
    %c0_i32_0 = arith.constant 0 : i32
    %c0_i32_1 = arith.constant 0 : i32
    %c0_i32_2 = arith.constant 0 : i32
    return %c0_i32, %c0_i32_0, %c0_i32_1 : i32, i32, i32
  }
  func.func @transform_8(%arg0: i32, %arg1: i32, %arg2: i32) -> (i32, i32, i32) {
    %c0_i32 = arith.constant 0 : i32
    %c0_i32_0 = arith.constant 0 : i32
    %c0_i32_1 = arith.constant 0 : i32
    %c0_i32_2 = arith.constant 0 : i32
    return %c0_i32, %c0_i32_0, %c0_i32_1 : i32, i32, i32
  }
  func.func @transform_9(%arg0: i32, %arg1: i32, %arg2: i32) -> (i32, i32, i32) {
    %c0_i32 = arith.constant 0 : i32
    %c0_i32_0 = arith.constant 0 : i32
    %c0_i32_1 = arith.constant 0 : i32
    %c0_i32_2 = arith.constant 0 : i32
    return %c0_i32, %c0_i32_0, %c0_i32_1 : i32, i32, i32
  }
  func.func @transform_10(%arg0: i32, %arg1: i32, %arg2: i32) -> (i32, i32) {
    %c0_i32 = arith.constant 0 : i32
    %c0_i32_0 = arith.constant 0 : i32
    %c0_i32_1 = arith.constant 0 : i32
    return %c0_i32, %c0_i32_0 : i32, i32
  }
  func.func @transform_11(%arg0: i32, %arg1: i32, %arg2: i32) -> (i32, i32, i32) {
    %c0_i32 = arith.constant 0 : i32
    %c0_i32_0 = arith.constant 0 : i32
    return %arg0, %arg1, %c0_i32 : i32, i32, i32
  }
}

</mosaic_0001>

<bundles_post_ra>
// kernel: tpu_custom_call.1
= control target key start
LH: loop header
LB: loop body
LE: loop exit
PB: predicated region body
PF: predicated region fallthrough
CT: control target
= control target key end

     0   :  { %s1972_s0 = inlined_call_operand.hbm [shape: f32[2,8,32], index: 0, kind: input, shape index: {}]   ;;  %s1973_s1 = inlined_call_operand.hbm [shape: f32[2,8,32], index: 1, kind: input, shape index: {}]   ;;  %s1974_s2 = inlined_call_operand.hbm [shape: f32[2,8,32], index: 2, kind: input, shape index: {}]   ;;  %s1975_s3 = inlined_call_operand.hbm [shape: bf16[4,8,32], index: 3, kind: input, shape index: {}]   ;;  %s1976_s4 = inlined_call_operand.hbm [shape: f32[4,1,8], index: 4, kind: input, shape index: {}]   ;;  %s1977_s5 = inlined_call_operand.hbm [shape: bf16[4,8,32], index: 5, kind: input, shape index: {}]   ;;  %s1978_s6 = inlined_call_operand.vmem [shape: f32[4,1,8], index: 6, kind: input, shape index: {}]   ;;  %s1979_s7 = inlined_call_operand.hbm [shape: bf16[4,8,32], index: 7, kind: input, shape index: {}]   ;;  %s1980_s8 = inlined_call_operand.hbm [shape: f32[4,1,8], index: 8, kind: input, shape index: {}]   ;;  %s1981_s9 = inlined_call_operand.hbm [shape: bf16[4,8,32], index: 9, kind: input, shape index: {}]   ;;  %s1982_s10 = inlined_call_operand.vmem [shape: f32[1,32], index: 10, kind: input, shape index: {}]   ;;  %s1983_s11 = inlined_call_operand.hbm [shape: f32[2,8,32], index: 11, kind: output, shape index: {}]  }
   0x1   :  { %2001 = sst [smem:[#allocation34_spill]] %s1972_s0 }
   0x2   :  { %2002 = sst [smem:[#allocation35_spill]] %s1973_s1 }
   0x3   :  { %2003 = sst [smem:[#allocation36_spill]] %s1975_s3 }
   0x4   :  { %2004 = sst [smem:[#allocation37_spill]] %s1976_s4 }
   0x5   :  { %2005 = sst [smem:[#allocation38_spill]] %s1977_s5 }
   0x6   :  { %2006 = sst [smem:[#allocation39_spill]] %s1979_s7 }
   0x7   :  { %2007 = sst [smem:[#allocation40_spill]] %s1980_s8 }
   0x8   :  { %2008 = sst [smem:[#allocation41_spill]] %s1983_s11 }
   0x9   :  { %16 = vsyncpa [#allocation4], 0 }
   0xa   :  { %18 = vsyncpa [#allocation4 + $0x1], 0 }
   0xb   :  { %19 = vsyncpa [#allocation7], 0 }
   0xc   :  { %21 = vsyncpa [#allocation7 + $0x1], 0 }
   0xd   :  { %22 = vsyncpa [#allocation10], 0 }
   0xe   :  { %23 = vsyncpa [#allocation13], 0 }
   0xf   :  { %24 = vsyncpa [#allocation16], 0 }
  0x10   :  { %25 = vsyncpa [#allocation5], 0 }
  0x11   :  { %27 = vsyncpa [#allocation5 + $0x1], 0  ;;  %s1673_s17 = smov 0   ;;  %s1675_s18 = smov 0  }
  0x12   :  { %s1677_s19 = smov 0   ;;  %s1679_s20 = smov 0  }
  0x13   :  { %s1681_s21 = smov 0   ;;  %s1683_s22 = smov 0  }
  0x14   :  { %s1685_s23 = smov 0   ;;  %s1687_s24 = smov 0  }
  0x15 LB: > { %2009 = sst [smem:[#allocation25_spill]] %s1572_s17  ;;  %s1714_s25 = sadd.s32 4294967295, %s1600_s24   ;;  %s1600_s24 = sphi %s1687_s24, %s33_s24   ;;  %s1596_s23 = sphi %s1685_s23, %s2046_s23   ;;  %s1592_s22 = sphi %s1683_s22, %s2045_s22   ;;  %s1588_s21 = sphi %s1681_s21, %s2044_s21   ;;  %s1584_s20 = sphi %s1679_s20, %s2043_s20   ;;  %s1580_s19 = sphi %s1677_s19, %s2049_s19   ;;  %s1576_s18 = sphi %s1675_s18, %s2048_s18   ;;  %s1572_s17 = sphi %s1673_s17, %s2047_s17  }
  0x16   : > { %2010 = sst [smem:[#allocation26_spill]] %s1592_s22  ;;  %p1011_p0 = scmp.ge.s32.totalorder %s1600_s24, 1 }
  0x17   : > { %2011 = sst [smem:[#allocation27_spill]] %s1596_s23  ;;  %p75_p1 = scmp.eq.s32.totalorder %s1714_s25, 0 }
  0x18   : > { %2012 = sst [smem:[#allocation28_spill]] %s1600_s24  ;;  %p333_p2 = scmp.lt.s32.totalorder %s1600_s24, 9 }
  0x19   : > { %s2013_s3 = sld [smem:[#allocation36_spill]]  ;;  %s1602_s30 = smov [#allocation9]  }
  0x1a   : > { %p1722_p3 = pnand %p1011_p0, %p333_p2  ;;  %s346_s12 = sshll.u32 %s1602_s30, 4  ;;  %s347_s12 = int_to_ptr.vmem [resolvable:$true] %s346_s12 }
  0x1b   : > { %s2016_s5 = sld [smem:[#allocation38_spill]]  ;;  %s1985_s26 = smov 64  }
  0x1c   : > { %p1084_p4 = pneg %p1722_p3  ;;  %s1987_s27 = smov 4  }
  0x1d   : > { %s1605_s30 = smov [#allocation12]   ;;  %s2017_s8 = sld [smem:[#allocation40_spill]] }
  0x1e   : > { %p1730_p5 = pnand %p1084_p4, %p75_p1  ;;  %s1606_s11 = smov [#allocation15]  }
  0x1f   : > { %s344_s28 = sshll.u32 %s2013_s3, 4  ;;  %s374_s3 = sshll.u32 %s1605_s30, 4  ;;  %s345_s28 = int_to_ptr.hbm [resolvable:$true] %s344_s28  ;;  %s375_s3 = int_to_ptr.vmem [resolvable:$true] %s374_s3 }
  0x20   : > { %1087 = dma.hbm_to_vmem [thread:$0]  (!%p1730_p5), %s345_s28, 256, %s347_s12, [#allocation10], %s1985_s26, %s1985_s26, %s1987_s27  }
  0x21   : > { %s372_s16 = sshll.u32 %s2016_s5, 4  ;;  %s405_s28 = sshll.u32 %s1606_s11, 4  ;;  %s373_s16 = int_to_ptr.hbm [resolvable:$true] %s372_s16  ;;  %s406_s28 = int_to_ptr.vmem [resolvable:$true] %s405_s28 }
  0x22   : > { %1093 = dma.hbm_to_vmem [thread:$0]  (!%p1730_p5), %s373_s16, 256, %s375_s3, [#allocation13], %s1985_s26, %s1985_s26, %s1987_s27  }
  0x23   : > { %s403_s5 = sshll.u32 %s2017_s8, 4  ;;  %s1989_s12 = smov 16   ;;  %s404_s5 = int_to_ptr.hbm [resolvable:$true] %s403_s5 }
  0x24   : > { %s1990_s30 = smov 1   ;;  %s1010_s3 = sadd.s32 4294967294, %s1600_s24  }
  0x25   : > { %1099 = dma.hbm_to_vmem [thread:$0]  (!%p1730_p5), %s404_s5, 64, %s406_s28, [#allocation16], %s1989_s12, %s1989_s12, %s1990_s30  }
  0x26   : > { %s45_s16 = sadd.s32 1, %s1592_s22  ;;  %s52_s14 = sadd.s32 1, %s1596_s23 }
  0x27   : > { %p46_p6 = scmp.ge.s32.totalorder %s45_s16, 4  ;;  %s61_s15 = sadd.s32 1, %s1580_s19 }
  0x28   : > { %p68_p7 = scmp.ne.s32.totalorder %s1580_s19, %s1576_s18  ;;  %p69_p8 = scmp.eq.s32.totalorder %s1600_s24, 0 }
  0x29   : > { %s2051_s16 = smov (%p46_p6, %s45_s16), 0  ;;  %s2053_s14 = smov (!%p46_p6, %s52_s14), %s1596_s23 }
  0x2a   : > { %2018 = sst [smem:[#allocation29_spill]] %s2051_s16  ;;  %p1765_p9 = por %p69_p8, %p68_p7 }
  0x2b   : > { %p74_p10 = scmp.ne.s32.totalorder %s1576_s18, %s1572_s17  ;;  %p54_p11 = scmp.ge.s32.totalorder %s2053_s14, 2 }
  0x2c   : > { %p320_p12 = scmp.eq.s32.totalorder %s1714_s25, 7  ;;  %p326_p0 = scmp.eq.s32.totalorder %s1010_s3, 7 }
  0x2d   : > { %p1774_p13 = por %p75_p1, %p74_p10  ;;  %s2055_s14 = smov (%p54_p11, %s2053_s14), 0 }
  0x2e   : > { %2021 = sst [smem:[#allocation30_spill]] %s2055_s14  ;;  %p1780_p2 = por %p320_p12, %p68_p7 }
  0x2f   : > { %p1784_p4 = por %p326_p0, %p74_p10  ;;  %s56_s27 = ssub.s32 %s1596_s23, %s2055_s14 }
  0x30   : > { %s2022_s28 = scalar_select %p1780_p2, 1, 0 }
  0x31   : > { %s2024_s26 = scalar_select %p1784_p4, 1, 0 }
  0x32   : > { %2023 = sst [smem:[#allocation31_spill]] %s2022_s28  ;;  %p1123_p6 = scmp.lt.s32.totalorder %s1600_s24, 8 }
  0x33   : > { %2025 = sst [smem:[#allocation32_spill]] %s2024_s26  ;;  %p59_p8 = scmp.eq.s32.totalorder %s56_s27, 0 }
  0x34   : > { %s1994_s12 = sand.u32 1, %s1580_s19   ;;  %s1797_s3 = sshll.u32 %s1596_s23, 3 }
  0x35   : > { %s1794_s30 = sshll.u32 %s1994_s12, 3  ;;  %p1804_p7 = pnand %p1123_p6, %p1765_p9 }
  0x36   : > { %s1800_s8 = scalar_select %p59_p8, %s1580_s19, %s61_s15  }
  0x37   : > { %s456_s14 = sand.u32 1, %s1600_s24   ;;  %s2028_s1 = sld [smem:[#allocation35_spill]] }
  0x38   : > { %2026 = sst [smem:[#allocation33_spill]] %s1800_s8  ;;  %s460_s17 = scalar_lea.vmem [#allocation6], %s1794_s30 }
  0x39   : > { %s468_s28 = sshll.u32 %s460_s17, 4  ;;  %s1814_s15 = scalar_lea.sflag [#allocation7], %s456_s14  ;;  %s469_s28 = int_to_ptr.vmem [resolvable:$true] %s468_s28 }
  0x3a   : > { %s2029_s4 = sld [smem:[#allocation37_spill]]  ;;  %s1609_s24 = smov [#allocation11]  }
  0x3b   : > { %s360_s22 = sshll.u32 %s1609_s24, 4  ;;  %s2030_s7 = sld [smem:[#allocation39_spill]]  ;;  %s361_s22 = int_to_ptr.vmem [resolvable:$true] %s360_s22 }
  0x3c   : > { %s2031_s14 = smov 1   ;;  %s417_s24 = sshll.u32 %s1981_s9, 4  ;;  %s418_s24 = int_to_ptr.hbm [resolvable:$true] %s417_s24 }
  0x3d   : > { %s464_s26 = scalar_lea.hbm %s2028_s1, %s1797_s3  ;;  %s2032_s1 = smov 16  }
  0x3e   : > { %s466_s12 = sshll.u32 %s464_s26, 4  ;;  %s2033_s26 = smov 4   ;;  %s467_s12 = int_to_ptr.hbm [resolvable:$true] %s466_s12 }
  0x3f   : > { %1109 = dma.hbm_to_vmem [thread:$0]  (!%p1804_p7), %s467_s12, 128, %s469_s28, %s1814_s15  }
  0x40   : > { %s358_s8 = sshll.u32 %s2029_s4, 4  ;;  %s1610_s12 = smov [#allocation14]   ;;  %s359_s8 = int_to_ptr.hbm [resolvable:$true] %s358_s8 }
  0x41   : > { %s389_s27 = sshll.u32 %s2030_s7, 4  ;;  %s391_s23 = sshll.u32 %s1610_s12, 4  ;;  %s390_s27 = int_to_ptr.hbm [resolvable:$true] %s389_s27  ;;  %s392_s23 = int_to_ptr.vmem [resolvable:$true] %s391_s23 }
  0x42   : > { %1090 = dma.hbm_to_vmem [thread:$0]  (!%p1730_p5), %s359_s8, 64, %s361_s22, [#allocation10], %s2032_s1, %s2032_s1, %s2031_s14  }
  0x43   : > { %s2034_s17 = smov 64   ;;  %s1611_s4 = smov [#allocation17]  }
  0x44   : > { %1096 = dma.hbm_to_vmem [thread:$0]  (!%p1730_p5), %s390_s27, 256, %s392_s23, [#allocation13], %s2034_s17, %s2034_s17, %s2033_s26  }
  0x45   : > { %s419_s1 = sshll.u32 %s1611_s4, 4  ;;  %s2035_s0 = sld [smem:[#allocation34_spill]]  ;;  %s420_s1 = int_to_ptr.vmem [resolvable:$true] %s419_s1 }
  0x46   : > { %1102 = dma.hbm_to_vmem [thread:$0]  (!%p1730_p5), %s418_s24, 256, %s420_s1, [#allocation16], %s2034_s17, %s2034_s17, %s2033_s26  }
  0x47   : > { %s440_s28 = scalar_lea.vmem [#allocation3], %s1794_s30  ;;  %s2036_s27 = sand.u32 1, %s1580_s19  }
  0x48   : > { %s449_s11 = sshll.u32 %s440_s28, 4  ;;  %s437_s23 = scalar_lea.sflag [#allocation4], %s2036_s27  ;;  %s450_s11 = int_to_ptr.vmem [resolvable:$true] %s449_s11 }
  0x49   : > { %s483_s8 = scalar_lea.hbm %s1974_s2, %s1797_s3  ;;  %s1863_s24 = sand.u32 (!%p1722_p3), 1, %s1576_s18  }
  0x4a   : > { %s485_s22 = sshll.u32 %s483_s8, 4  ;;  %496 = sbr.rel (%p1722_p3) target bundleno = 813 (0x32d), region = 64  ;;  %s486_s22 = int_to_ptr.hbm [resolvable:$true] %s485_s22 }
  0x4b   : > { %s445_s14 = scalar_lea.hbm %s2035_s0, %s1797_s3  ;;  %s479_s0 = scalar_lea.vmem [#allocation8], %s1794_s30 }
  0x4c   : > { %s447_s12 = sshll.u32 %s445_s14, 4  ;;  %s487_s13 = sshll.u32 %s479_s0, 4  ;;  %s448_s12 = int_to_ptr.hbm [resolvable:$true] %s447_s12  ;;  %s488_s13 = int_to_ptr.vmem [resolvable:$true] %s487_s13 }
  0x4d   : > { %1106 = dma.hbm_to_vmem [thread:$0]  (!%p1804_p7), %s448_s12, 128, %s450_s11, %s437_s23  }
  0x4e   : > { %1112 = dma.hbm_to_vmem [thread:$0]  (!%p1804_p7), %s486_s22, 128, %s488_s13, %s1814_s15  }
  0x4f   : > { %s1866_s26 = sshll.u32 %s1863_s24, 3  ;;  %s499_s7 = scalar_lea.sflag [#allocation4], %s1863_s24 }
  0x50   : > { %s502_s3 = scalar_lea.vmem [#allocation3], %s1866_s26 }
  0x51   : > { %1547 = dma.done.wait (%p1774_p13), %s499_s7, 128  }
  0x52   : > { %1549 = vsyncadd (%p1774_p13), %s499_s7, 4294967168  ;;  %s508_s0 = sand.u32 1, %s1714_s25   ;;  %s512_s30 = scalar_lea.vmem [#allocation6], %s1866_s26 }
  0x53   : > { %s509_s29 = scalar_lea.sflag [#allocation7], %s508_s0 }
  0x54   : > { %1551 = dma.done.wait (%p1774_p13), %s509_s29, 256  }
  0x55   : > { %1553 = vsyncadd (%p1774_p13), %s509_s29, 4294967040  ;;  %s522_s16 = scalar_lea.vmem [#allocation8], %s1866_s26 }
  0x56   : > { %1555 = dma.done.wait (%p75_p1), [#allocation10], 320  }
  0x57   : > { %1557 = vsyncadd (%p75_p1), [#allocation10], 4294966976 }
  0x58   : > { %1559 = dma.done.wait (%p75_p1), [#allocation13], 512  }
  0x59   : > { %1561 = vsyncadd (%p75_p1), [#allocation13], 4294966784 }
  0x5a   : > { %1563 = dma.done.wait (%p75_p1), [#allocation16], 320  }
  0x5b   : > { %1565 = vsyncadd (%p75_p1), [#allocation16], 4294966976  ;;  %s1894_s5 = sshll.u32 %s1584_s20, 2  ;;  %vm613_vm0 = vcmask 261120   ;;  %s608_s1 = scalar_lea.vmem [#allocation11], %s1584_s20  ;;  %v603_v4 = vld [vmem:[%s502_s3] sm:$0xff] }
  0x5c   : > { %s606_s15 = scalar_lea.vmem [#allocation9], %s1894_s5  ;;  %s639_s17 = scalar_lea.vmem [#allocation12], %s1894_s5  ;;  %v634_v5 = vld [vmem:[%s512_s30] sm:$0xff]  ;;  %v604_v6 = vpack.c.bf16 %v603_v4, %v603_v4  ;;  %v636_v10 = vld [vmem:[%s522_s16] sm:$0xff]  ;;  %vm694_vm1 = vcmask 64512   ;;  %vm733_vm2 = vcmask 1043456  }
  0x5d   : > { %v607_v0 = vld [vmem:[%s606_s15] sm:$0xf]  ;;  %s641_s12 = scalar_lea.vmem %s1978_s6, %s1584_s20  ;;  %v635_v7 = vpack.c.bf16 %v634_v5, %v634_v5  ;;  %s667_s28 = scalar_lea.vmem [#allocation14], %s1894_s5  ;;  %v637_v11 = vpack.c.bf16 %v636_v10, %v636_v10 }
  0x5e   : > { %v640_v1 = vld [vmem:[%s639_s17] sm:$0xf]  ;;  %v618_v2 = vsel %vm613_vm0, %v607_v0, 0  ;;  %s669_s11 = scalar_lea.vmem [#allocation15], %s1584_s20  ;;  %s755_s27 = scalar_lea.vmem [#allocation17], %s1894_s5 }
  0x5f   : > { %v650_v3 = vsel %vm613_vm0, %v640_v1, 0  ;;  %627 = vmatpush.bf16.xpose.msra.mxu0 %v618_v2  ;;  %v668_v8 = vld [vmem:[%s667_s28] sm:$0xf]  ;;  %s601_s23 = scalar_lea.vmem [#allocation18], %s1866_s26  ;;  %p1046_p1 = scmp.ne.s32.totalorder %s1584_s20, 0 }
  0x60   : > { %659 = vmatpush.bf16.xpose.msra.mxu1 %v650_v3  ;;  %v678_v9 = vsel %vm613_vm0, %v668_v8, 0  ;;  %v1207_v12 = vld [vmem:[%s641_s12] ss:$0 sm:$0xff] }
  0x61   : > { %687 = vmatpush.bf16.xpose.msra.mxu2 %v678_v9  ;;  %v1206_v15 = vld [vmem:[%s608_s1] ss:$0 sm:$0xff] }
  0x62   : > { %v1208_v23 = vld [vmem:[%s669_s11] ss:$0 sm:$0xff] }
  0x63   : > { %v756_v39 = vld [vmem:[%s755_s27] sm:$0xf] }
  0x64   : > { %v761_v40 = vsel %vm733_vm2, %v756_v39, 0 }
  0x66   : > { %1037 = vmatmul.msk.bf16.vlgmr.msra.gmra.mxu0 %vm613_vm0, %v604_v6 }
  0x67   : > { %1039 = vmatmul.msk.bf16.vlgmr.msra.gmra.mxu1 %vm613_vm0, %v635_v7 }
  0x68   : > { %1041 = vmatmul.msk.bf16.vlgmr.msra.gmra.mxu2 %vm613_vm0, %v637_v11  ;;  %770 = vmatpush.bf16.msrb.mxu1 %v761_v40 }
  0xe3   : > { %v629_v13 = vpop.f32.mrf.mxu0 }
  0xe4   : > { %v661_v14 = vpop.f32.mrf.mxu1  ;;  %v630_v18 = vadd.f32 %v1206_v15, %v629_v13 }
  0xe5   : > { %v662_v16 = vadd.f32 %v1207_v12, %v661_v14 }
  0xe6   : > { %v633_v22 = vpack.c.bf16 %v630_v18, %v630_v18 }
  0xe7   : > { %v665_v17 = vpack.c.bf16 %v662_v16, %v662_v16 }
  0xe9   : > { %v699_v19 = vsel %vm694_vm1, %v665_v17, 0 }
  0xea   : > { %708 = vmatpush.bf16.xpose.msra.mxu3 %v699_v19 }
  0xeb   : > { %v631_v20 = vpop.f32.mrf.mxu0  ;;  %v689_v24 = vpop.f32.mrf.mxu2 }
  0xec   : > { %v663_v21 = vpop.f32.mrf.mxu1  ;;  %v690_v25 = vadd.f32 %v1208_v23, %v689_v24 }
  0xee   : > { %v693_v26 = vpack.c.bf16 %v690_v25, %v690_v25 }
  0xf0   : > { %v735_v27 = vsel %vm733_vm2, %v693_v26, 0 }
  0xf1   : > { %1042 = vmatmul.msk.bf16.vlgmr.msra.gmra.mxu3 %vm694_vm1, %v633_v22  ;;  %744 = vmatpush.bf16.msrb.mxu0 %v735_v27 }
  0xf3   : > { %v691_v28 = vpop.f32.mrf.mxu2 }
 0x174   : > { %v710_v29 = vpop.f32.mrf.mxu3 }
 0x175   : > { %v714_v30 = vsel %vm694_vm1, %v710_v29, -inf }
 0x176   : > { %715 = vmax.xlane.f32.xlu0 %v714_v30 }
 0x17c   : > { %v712_v31 = vpop.f32.mrf.mxu3 }
 0x1e9   : > { %v716_v32 = vpop.xlane.xlu0 %715 }
 0x1ea   : > { %v717_v33 = vmax.f32 %v716_v32, -1e+30 }
 0x1ec   : > { %v721_v34 = vsub.f32 %v710_v29, %v717_v33  ;;  %v718_v41 = vsub.f32 -1e+30, %v717_v33 }
 0x1ee   : > { %v722_v35 = vmul.f32 1.442695, %v721_v34  ;;  %v719_v42 = vmul.f32 1.442695, %v718_v41 }
 0x1f0   : > { %1209 = vpow2.f32 %v722_v35 }
 0x1f1   : > { %1211 = vpow2.f32 %v719_v42 }
 0x1f6   : > { %v1210_v36 = vpop.eup %1209 }
 0x1f7   : > { %v725_v37 = vsel %vm694_vm1, %v1210_v36, 0.0  ;;  %v729_v38 = vpack.c.bf16 %v1210_v36, %v1210_v36  ;;  %v1212_v43 = vpop.eup %1211 }
 0x1f8   : > { %726 = vadd.xlane.f32.xlu0 %v725_v37  ;;  %v724_v45 = vmul.f32 0.0, %v1212_v43 }
 0x1f9   : > { %1043 = vmatmul.msk.bf16.vlgmr.msrb.gmra.mxu0 %vm694_vm1, %v729_v38 }
 0x26b   : > { %v727_v44 = vpop.xlane.xlu0 %726 }
 0x26c   : > { %v728_v46 = vadd.f32 %v727_v44, %v724_v45 }
 0x26e   : > { %1213 = vrcp.f32 %v728_v46 }
 0x274   : > { %v1214_v49 = vpop.eup %1213 }
 0x276   : > { %v746_v47 = vpop.f32.mrf.mxu0 }
 0x277   : > { %v750_v48 = vadd.f32 %v746_v47, %v724_v45 }
 0x279   : > { %v752_v50 = vmul.f32 %v1214_v49, %v750_v48 }
 0x27b   : > { %v753_v51 = vpack.c.bf16 %v752_v50, %v752_v50 }
 0x27d   : > { %1045 = vmatmul.msk.bf16.vlgmr.msrb.gmra.mxu1 %vm694_vm1, %v753_v51 }
 0x27e   : > { %v748_v52 = vpop.f32.mrf.mxu0 }
 0x2fa   : > { %v772_v53 = vpop.f32.mrf.mxu1 }
 0x2fe   : > { %779 = sbr.rel (%p1046_p1) target bundleno = 773 (0x305), region = 104 }
 0x302   : > { %v774_v54 = vpop.f32.mrf.mxu1 }
 0x303   : > { %v1612_v55 = vmov 0.0  }
 0x304   : > { %780 = vst.msk [vmem:[#allocation2] sm:$0xff] %vm613_vm0, %v1612_v55 }
 0x305 PF: > { %p1047_p3 = scmp.ne.s32.totalorder %s1584_s20, 3 }
 0x30a   : > { %787 = sbr.rel (%p1047_p3) target bundleno = 793 (0x319), region = 108 }
 0x30b   : > { %v781_v56 = vld [vmem:[#allocation2] sm:$0xff] }
 0x30c   : > { %v782_v57 = vadd.f32 %v781_v56, %v772_v53 }
 0x30e   : > { %783 = vst.msk [vmem:[#allocation2] sm:$0xff] %vm613_vm0, %v782_v57 }
 0x30f   : > { %v1215_v59 = vld [vmem:[%s1982_s10] ss:$0 sm:$0xff] }
 0x315   : > { %v788_v58 = vld [vmem:[#allocation2] sm:$0xff] }
 0x316   : > { %v793_v60 = vadd.f32 %v1215_v59, %v788_v58 }
 0x318   : > { %794 = vst.msk [vmem:[%s601_s23] sm:$0xff] %vm613_vm0, %v793_v60 }
 0x319 PF: > { %s1049_s13 = sshll.u32 %s1588_s21, 3  ;;  %s2038_s3 = sld [smem:[#allocation41_spill]] }
 0x31a   : > { %s809_s29 = sshll.u32 %s601_s23, 4  ;;  %s796_s30 = scalar_lea.sflag [#allocation5], %s1863_s24  ;;  %s810_s29 = int_to_ptr.vmem [resolvable:$true] %s809_s29 }
 0x31f   : > { %s807_s0 = scalar_lea.hbm %s2038_s3, %s1049_s13  ;;  %s1506_s21 = scalar_lea.hbm %s2038_s3, 16 }
 0x320   : > { %s811_s20 = sshll.u32 %s807_s0, 4  ;;  %s812_s20 = int_to_ptr.hbm [resolvable:$true] %s811_s20 }
 0x321   : > { %s1500_s16 = sshra.s32 %s812_s20, 4  ;;  %s1501_s16 = int_to_ptr.hbm [resolvable:$true] %s1500_s16 }
 0x322   : > { %s1502_s5 = scalar_lea.hbm %s1501_s16, 8  ;;  %p1507_p11 = scmp.lt.s32.totalorder %s1501_s16, %s2038_s3 }
 0x323   : > { %p1503_p5 = scmp.ne.s32.totalorder %s1501_s16, %s1502_s5  ;;  %p1508_p12 = scmp.lt.s32.totalorder %s1506_s21, %s1502_s5 }
 0x325   : > { %p1504_p9 = pnand %p1503_p5, %p1780_p2  ;;  %p1509_p13 = por %p1508_p12, %p1507_p11 }
 0x327   : > { %p1505_p10 = pneg %p1504_p9 }
 0x329   : > { %p1510_p0 = pnand %p1509_p13, %p1505_p10 }
 0x32b   : > { %1513 = shalt.err (!%p1510_p0)
}
 0x32c   : > { %1082 = dma.vmem_to_hbm [thread:$0]  (%p1780_p2), %s810_s29, 128, %s812_s20, %s796_s30  }
 0x32d PF: > { %s2039_s24 = sld [smem:[#allocation28_spill]] }
 0x32e   : > { %s2040_s14 = sld [smem:[#allocation25_spill]] }
 0x333   : > { %p1130_p6 = scmp.ge.s32.totalorder %s2039_s24, 2 }
 0x334   : > { %s823_s28 = sand.u32 1, %s2040_s14  }
 0x335   : > { %p1114_p8 = pnand %p1130_p6, %p1784_p4  ;;  %s824_s11 = scalar_lea.sflag [#allocation5], %s823_s28 }
 0x337   : > { %p1115_p7 = pneg %p1114_p8 }
 0x339   : > { %1567 = dma.done.wait (%p1115_p7), %s824_s11, 128  }
 0x33a   : > { %1569 = vsyncadd (%p1115_p7), %s824_s11, 4294967168  ;;  %s33_s24 = sadd.s32 1, %s2039_s24   ;;  %s2042_s27 = sld [smem:[#allocation33_spill]] }
 0x33b   : > { %p30_p1 = scmp.ge.s32.totalorder %s33_s24, 10   ;;  %s2043_s20 = sld [smem:[#allocation26_spill]] }
 0x33c   : > { %s2044_s21 = sld [smem:[#allocation27_spill]]  ;;  %s2047_s17 = smov %s1576_s18 }
 0x33d   : > { %s2045_s22 = sld [smem:[#allocation29_spill]]  ;;  %s2048_s18 = smov %s1580_s19 }
 0x33e   : > { %s2046_s23 = sld [smem:[#allocation30_spill]]  ;;  %32 = sbr.rel (!%p30_p1) target bundleno = 21 (0x15), region = 172 }
 0x340   : > { %s2049_s19 = smov %s2042_s27 }
 0x343   :  { %830 = vsyncpa [#allocation4], 1 }
 0x344   :  { %832 = vsyncpa [#allocation4 + $0x1], 1 }
 0x345   :  { %833 = vsyncpa [#allocation7], 1 }
 0x346   :  { %835 = vsyncpa [#allocation7 + $0x1], 1 }
 0x347   :  { %836 = vsyncpa [#allocation10], 1 }
 0x348   :  { %837 = vsyncpa [#allocation13], 1 }
 0x349   :  { %838 = vsyncpa [#allocation16], 1 }
 0x34a   :  { %839 = vsyncpa [#allocation5], 1 }
 0x34b   :  { %841 = vsyncpa [#allocation5 + $0x1], 1 }

</bundles_post_ra>
